<compile_context>
chip_gen: v5e
topology: v5e:2x2
jax: 0.10.0
libtpu: 0.0.40
codegen_flags: <defaults>
</compile_context>

<pallas_src>
import functools
import math

import jax
import jax.numpy as jnp
from jax import lax
from jax.experimental import pallas as pl
from jax.experimental.pallas import tpu as pltpu
import numpy as np

_MIB = 1024 * 1024


def _normalize_param(p, dim):
    if isinstance(p, (int, float)):
        return [p] * dim
    return list(p)


def _gaussian_taps_1d(kernel_size, sigma):
    """Normalized 1-D Gaussian taps as python floats (trace-time constants).

    The PyTorch module builds the 2-D kernel as the outer product of per-axis
    Gaussians and normalizes by the total sum; that equals the outer product of
    per-axis *normalized* Gaussians, so the separable form is exact.
    """
    k = int(kernel_size)
    std = float(sigma)
    mean = (k - 1) / 2.0
    g = np.exp(-(((np.arange(k, dtype=np.float64) - mean) / std) ** 2) / 2.0)
    g = g / g.sum()
    return tuple(float(v) for v in g)


def make_gaussian_weight(channels, kernel_size, sigma, dim=2):
    """Replicates GaussianSmoothing.__init__ weight construction (float32)."""
    ks = _normalize_param(kernel_size, dim)
    sg = _normalize_param(sigma, dim)
    kernel = np.array(1.0, dtype=np.float32)
    meshgrids = np.meshgrid(
        *[np.arange(int(s), dtype=np.float32) for s in ks], indexing="ij")
    for size, std, mgrid in zip(ks, sg, meshgrids):
        mean = (size - 1) / 2.0
        kernel = kernel * (
            1.0 / (std * math.sqrt(2.0 * math.pi))
            * np.exp(-(((mgrid - mean) / std) ** 2) / 2.0))
    kernel = kernel / np.sum(kernel)
    kernel = np.broadcast_to(kernel[None, None, ...],
                             (channels, 1) + tuple(int(s) for s in ks)).copy()
    return jnp.asarray(kernel, dtype=jnp.float32)


def _round_up(x, m):
    return ((x + m - 1) // m) * m


def _buf_bytes(n, h, w, itemsize):
    # Each 2-D (h, w) slice is physically tiled to (8, 128) in VMEM.
    return n * _round_up(h, 8) * _round_up(max(w, 1), 128) * itemsize


def _vmem_budget():
    """(block-sizing budget, compiler vmem limit) in bytes, generation-aware."""
    cap = None
    try:
        cap = int(getattr(pltpu.get_tpu_info(), "vmem_capacity_bytes", 0)) or None
    except Exception:
        cap = None
    if cap is None:
        cap = 64 * _MIB                      # conservative default (v7x per-TC)
    if cap <= 64 * _MIB:                     # v7x-class: 64 MiB/TC
        return 24 * _MIB, 40 * _MIB
    return 64 * _MIB, 96 * _MIB              # v5e/v6e: 128 MiB physical


def _sym_accum(load, taps):
    """sum_k taps[k] * load(k), pairing symmetric taps (1 mul per pair)."""
    k_total = len(taps)
    acc = None
    for k in range((k_total + 1) // 2):
        j = k_total - 1 - k
        term = load(k) if j == k else load(k) + load(j)
        term = taps[k] * term
        acc = term if acc is None else acc + term
    return acc


def _smooth_kernel(x_ref, o_ref, tmp_ref, *, taps_h, taps_w, ho, wo):
    # x_ref:   VMEM (n_blk, H, W)    input slab (flattened B*C leading axis)
    # o_ref:   VMEM (n_blk, Ho, Wo)  exact 'valid' output (no pad, no slice)
    # tmp_ref: VMEM (n_blk, H, Wo)   f32 scratch (horizontal-pass result)
    # Horizontal (lane-direction) pass: K taps along W.
    tmp_ref[...] = _sym_accum(
        lambda k: x_ref[:, :, pl.ds(k, wo)].astype(jnp.float32), taps_w)
    # Vertical (sublane-direction) pass: K taps along H.
    o_ref[...] = _sym_accum(
        lambda k: tmp_ref[:, pl.ds(k, ho), :], taps_h).astype(o_ref.dtype)


def gaussian_smoothing(x, kernel_size, sigma):
    """Depthwise 'valid' Gaussian conv2d (groups = channels), NCHW layout.

    x: (B, C, H, W) -> (B, C, H-Kh+1, W-Kw+1)
    """
    B, C, H, W = x.shape
    kh, kw = (int(v) for v in _normalize_param(kernel_size, 2))
    sh, sw = _normalize_param(sigma, 2)
    Ho, Wo = H - kh + 1, W - kw + 1
    assert Ho >= 1 and Wo >= 1, "kernel larger than input"

    taps_h = _gaussian_taps_1d(kh, sh)
    taps_w = _gaussian_taps_1d(kw, sw)

    # Flatten (B, C) -> N so blocks can span batches (depthwise: channels are
    # fully independent).  A contiguous reshape is metadata-only in XLA.
    N = B * C
    x_flat = x.reshape(N, H, W)

    itemsize = jnp.dtype(x.dtype).itemsize
    per_chan = (2 * _buf_bytes(1, H, W, itemsize)       # double-buffered input
                + 2 * _buf_bytes(1, Ho, Wo, itemsize)   # double-buffered output
                + _buf_bytes(1, H, Wo, 4))              # f32 scratch
    budget, vmem_limit = _vmem_budget()
    n_fit = max(1, budget // per_chan)
    # Cap the block so the grid has >= ~4 steps (pipeline overlap; >= 2 steps
    # also keeps both v7x TensorCores busy via the "parallel" grid axis).
    n_cap = pl.cdiv(N, min(4, N))
    n_block = int(max(1, min(n_fit, n_cap, N)))
    num_blocks = pl.cdiv(N, n_block)
    # TODO(synk): if even n_block=1 exceeds the VMEM budget (very large H*W),
    # add H-strip tiling with a (kh-1)-row halo and a rolling f32 scratch.

    kernel = functools.partial(_smooth_kernel, taps_h=taps_h, taps_w=taps_w,
                               ho=Ho, wo=Wo)

    out = pl.pallas_call(
        kernel,
        out_shape=jax.ShapeDtypeStruct((N, Ho, Wo), x.dtype),
        grid=(num_blocks,),
        in_specs=[pl.BlockSpec((n_block, H, W), lambda n: (n, 0, 0))],
        out_specs=pl.BlockSpec((n_block, Ho, Wo), lambda n: (n, 0, 0)),
        scratch_shapes=[pltpu.VMEM((n_block, H, Wo), jnp.float32)],
        compiler_params=pltpu.CompilerParams(
            dimension_semantics=("parallel",),
            vmem_limit_bytes=vmem_limit),
    )(x_flat)

    return out.reshape(B, C, Ho, Wo)


def _reference(x, weight):
    # Depthwise conv via lax, for verification.
    C = x.shape[1]
    return lax.conv_general_dilated(
        x, weight,
        window_strides=(1, 1), padding="VALID",
        dimension_numbers=("NCHW", "OIHW", "NCHW"),
        feature_group_count=C)


if __name__ == "__main__":
    B, C, H, W = 2, 4, 16, 16
    KSIZE, SIGMA = 3, 1.0

    key = jax.random.PRNGKey(0)
    x = jax.random.normal(key, (B, C, H, W), dtype=jnp.float32)

    out = gaussian_smoothing(x, KSIZE, SIGMA)
    out = jax.block_until_ready(out)

    weight = make_gaussian_weight(C, KSIZE, SIGMA, dim=2)
    ref = _reference(x, weight)
    assert out.shape == (B, C, H - KSIZE + 1, W - KSIZE + 1), out.shape
    np.testing.assert_allclose(np.asarray(out), np.asarray(ref),
                               rtol=1e-5, atol=1e-5)
    print("KERNEL_OK")
</pallas_src>

<mosaic_0001>
module attributes {stable_mosaic.version = 11 : i64} {
  func.func @_smooth_kernel(%arg0: i32, %arg1: memref<2x16x16xf32, #tpu.memory_space<vmem>>, %arg2: memref<2x14x14xf32, #tpu.memory_space<vmem>>, %arg3: memref<2x16x14xf32, #tpu.memory_space<vmem>>) attributes {dimension_semantics = [#tpu.dimension_semantics<parallel>], iteration_bounds = array<i64: 4>, scalar_prefetch = 0 : i64, scratch_operands = 1 : i64, tpu.core_type = #tpu.core_type<tc>, window_params = [{transform_indices = @transform_0, window_bounds = array<i64: 2, 16, 16>}, {transform_indices = @transform_1, window_bounds = array<i64: 2, 14, 14>}]} {
    %c0 = arith.constant 0 : index
    %c0_0 = arith.constant 0 : index
    %c0_1 = arith.constant 0 : index
    %0 = vector.load %arg1[%c0, %c0_0, %c0_1] : memref<2x16x16xf32, #tpu.memory_space<vmem>>, vector<2x16x14xf32>
    %c0_2 = arith.constant 0 : index
    %c0_3 = arith.constant 0 : index
    %c2 = arith.constant 2 : index
    %1 = vector.load %arg1[%c0_2, %c0_3, %c2] : memref<2x16x16xf32, #tpu.memory_space<vmem>>, vector<2x16x14xf32>
    %2 = arith.addf %0, %1 : vector<2x16x14xf32>
    %cst = arith.constant 0.274068624 : f32
    %3 = vector.broadcast %cst : f32 to vector<2x16x14xf32>
    %4 = arith.mulf %3, %2 : vector<2x16x14xf32>
    %c0_4 = arith.constant 0 : index
    %c0_5 = arith.constant 0 : index
    %c1 = arith.constant 1 : index
    %5 = vector.load %arg1[%c0_4, %c0_5, %c1] : memref<2x16x16xf32, #tpu.memory_space<vmem>>, vector<2x16x14xf32>
    %cst_6 = arith.constant 0.451862752 : f32
    %6 = vector.broadcast %cst_6 : f32 to vector<2x16x14xf32>
    %7 = arith.mulf %6, %5 : vector<2x16x14xf32>
    %8 = arith.addf %4, %7 : vector<2x16x14xf32>
    %c0_7 = arith.constant 0 : index
    %c0_8 = arith.constant 0 : index
    %c0_9 = arith.constant 0 : index
    %9 = vector.load %arg3[%c0_7, %c0_8, %c0_9] : memref<2x16x14xf32, #tpu.memory_space<vmem>>, vector<2x16x14xf32>
    tpu.vector_store %arg3[%c0_7, %c0_8, %c0_9], %8 {strides = array<i32>} : memref<2x16x14xf32, #tpu.memory_space<vmem>>, vector<2x16x14xf32>,
    %c0_10 = arith.constant 0 : index
    %c0_11 = arith.constant 0 : index
    %c0_12 = arith.constant 0 : index
    %10 = vector.load %arg3[%c0_10, %c0_11, %c0_12] : memref<2x16x14xf32, #tpu.memory_space<vmem>>, vector<2x14x14xf32>
    %c0_13 = arith.constant 0 : index
    %c2_14 = arith.constant 2 : index
    %c0_15 = arith.constant 0 : index
    %11 = vector.load %arg3[%c0_13, %c2_14, %c0_15] : memref<2x16x14xf32, #tpu.memory_space<vmem>>, vector<2x14x14xf32>
    %12 = arith.addf %10, %11 : vector<2x14x14xf32>
    %cst_16 = arith.constant 0.274068624 : f32
    %13 = vector.broadcast %cst_16 : f32 to vector<2x14x14xf32>
    %14 = arith.mulf %13, %12 : vector<2x14x14xf32>
    %c0_17 = arith.constant 0 : index
    %c1_18 = arith.constant 1 : index
    %c0_19 = arith.constant 0 : index
    %15 = vector.load %arg3[%c0_17, %c1_18, %c0_19] : memref<2x16x14xf32, #tpu.memory_space<vmem>>, vector<2x14x14xf32>
    %cst_20 = arith.constant 0.451862752 : f32
    %16 = vector.broadcast %cst_20 : f32 to vector<2x14x14xf32>
    %17 = arith.mulf %16, %15 : vector<2x14x14xf32>
    %18 = arith.addf %14, %17 : vector<2x14x14xf32>
    %c0_21 = arith.constant 0 : index
    %c0_22 = arith.constant 0 : index
    %c0_23 = arith.constant 0 : index
    %19 = vector.load %arg2[%c0_21, %c0_22, %c0_23] : memref<2x14x14xf32, #tpu.memory_space<vmem>>, vector<2x14x14xf32>
    tpu.vector_store %arg2[%c0_21, %c0_22, %c0_23], %18 {strides = array<i32>} : memref<2x14x14xf32, #tpu.memory_space<vmem>>, vector<2x14x14xf32>,
    return
  }
  func.func @transform_0(%arg0: i32) -> (i32, i32, i32) {
    %c0_i32 = arith.constant 0 : i32
    %c0_i32_0 = arith.constant 0 : i32
    %c0_i32_1 = arith.constant 0 : i32
    return %arg0, %c0_i32, %c0_i32_0 : i32, i32, i32
  }
  func.func @transform_1(%arg0: i32) -> (i32, i32, i32) {
    %c0_i32 = arith.constant 0 : i32
    %c0_i32_0 = arith.constant 0 : i32
    %c0_i32_1 = arith.constant 0 : i32
    return %arg0, %c0_i32, %c0_i32_0 : i32, i32, i32
  }
}

</mosaic_0001>

<bundles_post_ra>
// kernel: tpu_custom_call.1
= control target key start
LH: loop header
LB: loop body
LE: loop exit
PB: predicated region body
PF: predicated region fallthrough
CT: control target
= control target key end

     0   :  { %6 = vsyncpa [#allocation4], 0  ;;  %s543_s0 = inlined_call_operand.hbm [shape: f32[8,16,16], index: 0, kind: input, shape index: {}]   ;;  %s544_s1 = inlined_call_operand.vmem [shape: f32[8,14,14], index: 1, kind: output, shape index: {}]  }
   0x1   :  { %8 = vsyncpa [#allocation4 + $0x1], 0  ;;  %s444_s6 = smov 0   ;;  %s446_s7 = smov 0  }
   0x2   :  { %s448_s8 = smov 0   ;;  %s450_s9 = smov 0  }
   0x3 LB: > { %s303_s10 = sadd.s32 4294967295, %s428_s9   ;;  %s464_s11 = sadd.s32 1, %s428_s9   ;;  %s428_s9 = sphi %s450_s9, %s551_s9   ;;  %s424_s8 = sphi %s448_s8, %s550_s8   ;;  %s420_s7 = sphi %s446_s7, %s549_s7   ;;  %s416_s6 = sphi %s444_s6, %s548_s6  }
   0x4   : > { %s18_s12 = ssub.s32 %s428_s9, %s464_s11  ;;  %s21_s13 = sadd.s32 1, %s424_s8 }
   0x5   : > { %p19_p0 = scmp.eq.s32.totalorder %s18_s12, 0  ;;  %p28_p1 = scmp.ne.s32.totalorder %s424_s8, %s420_s7 }
   0x6   : > { %p29_p2 = scmp.eq.s32.totalorder %s428_s9, 0  ;;  %p34_p3 = scmp.ne.s32.totalorder %s420_s7, %s416_s6 }
   0x7   : > { %s474_s14 = scalar_select %p19_p0, %s424_s8, %s21_s13  }
   0x8   : > { %p476_p4 = por %p29_p2, %p28_p1  ;;  %p35_p5 = scmp.eq.s32.totalorder %s303_s10, 0 }
   0x9   : > { %p327_p6 = scmp.lt.s32.totalorder %s428_s9, 4  ;;  %s84_s17 = sand.u32 1, %s424_s8  }
   0xa   : > { %p483_p7 = por %p35_p5, %p34_p3  ;;  %s307_s18 = sshll.u32 %s84_s17, 5 }
   0xb   : > { %s319_s19 = sshll.u32 %s428_s9, 5  ;;  %s88_s23 = scalar_lea.vmem [#allocation3], %s307_s18 }
   0xc   : > { %s94_s22 = scalar_lea.hbm %s543_s0, %s319_s19  ;;  %s97_s24 = sshll.u32 %s88_s23, 4  ;;  %s98_s24 = int_to_ptr.vmem [resolvable:$true] %s97_s24 }
   0xd   : > { %s95_s25 = sshll.u32 %s94_s22, 4  ;;  %p494_p8 = pnand %p327_p6, %p476_p4  ;;  %s96_s25 = int_to_ptr.hbm [resolvable:$true] %s95_s25 }
   0xe   : > { %p311_p9 = scmp.ge.s32.totalorder %s428_s9, 1  ;;  %s85_s27 = scalar_lea.sflag [#allocation4], %s84_s17 }
   0xf   : > { %s364_s28 = sshra.s32 %s96_s25, 4  ;;  %p368_p11 = pneg %p494_p8  ;;  %s365_s28 = int_to_ptr.hbm [resolvable:$true] %s364_s28 }
  0x10   : > { %s366_s29 = scalar_lea.hbm %s365_s28, 32  ;;  %s371_s3 = scalar_lea.hbm %s543_s0, 128 }
  0x11   : > { %p367_p10 = scmp.ne.s32.totalorder %s365_s28, %s366_s29  ;;  %p372_p0 = scmp.lt.s32.totalorder %s365_s28, %s543_s0 }
  0x12   : > { %p373_p1 = scmp.lt.s32.totalorder %s371_s3, %s366_s29 }
  0x13   : > { %p369_p12 = pnand %p368_p11, %p367_p10 }
  0x14   : > { %p374_p2 = por %p373_p1, %p372_p0 }
  0x15   : > { %p370_p13 = pneg %p369_p12 }
  0x17   : > { %p375_p3 = pnand %p374_p2, %p370_p13 }
  0x19   : > { %378 = shalt.err (!%p375_p3)
}
  0x1a   : > { %s430_s6 = smov 128   ;;  %s431_s12 = smov 8  }
  0x1b   : > { %326 = dma.hbm_to_vmem [thread:$0]  (!%p494_p8), %s96_s25, 512, %s98_s24, %s85_s27, %s430_s6, %s430_s6, %s431_s12  }
  0x1c   : > { %p105_p4 = scmp.lt.s32.totalorder %s428_s9, 5 }
  0x1e   : > { %p106_p5 = pnand %p311_p9, %p105_p4 }
  0x1f   : > { %s111_s13 = sand.u32 (!%p106_p5), 1, %s420_s7  }
  0x20   : > { %109 = sbr.rel (%p106_p5) target bundleno = 190 (0xbe), region = 24  ;;  %s312_s15 = sshll.u32 (!%p106_p5), %s111_s13, 5 }
  0x21   : > { %s112_s17 = scalar_lea.sflag (!%p106_p5), [#allocation4], %s111_s13  ;;  %s115_s18 = scalar_lea.vmem (!%p106_p5), [#allocation3], %s312_s15 }
  0x25   : > { %411 = dma.done.wait (%p483_p7), %s112_s17, 512  }
  0x26   : > { %413 = vsyncadd (%p483_p7), %s112_s17, 4294966784  ;;  %v146_v0 = vld [vmem:[%s115_s18 + $0x10] sm:$0xff]  ;;  %v144_v1 = vld [vmem:[%s115_s18] sm:$0xff]  ;;  %s432_s19 = smov 126   ;;  %s433_s20 = smov 127   ;;  %vm196_vm0 = vcmask 113664  }
  0x27   : > { %156 = vrot.lane.b32.xlu1 %v146_v0, %s432_s19  ;;  %152 = vrot.lane.b32.xlu0 %v144_v1, %s432_s19  ;;  %v172_v2 = vmul.f32 0.45186275, %v144_v1  ;;  %v147_v3 = vld [vmem:[%s115_s18 + $0x18] sm:$0xff]  ;;  %v145_v4 = vld [vmem:[%s115_s18 + $0x8] sm:$0xff]  ;;  %v174_v7 = vmul.f32 0.45186275, %v146_v0 }
  0x28   : > { %v173_v5 = vmul.f32 0.45186275, %v145_v4  ;;  %v175_v6 = vmul.f32 0.45186275, %v147_v3  ;;  %s313_s16 = sshll.u32 %s303_s10, 1  ;;  %vm230_vm1 = vcmask 111616  }
  0x29   : > { %180 = vrot.lane.b32.xlu2 %v172_v2, %s433_s20  ;;  %p138_p6 = scmp.lt.s32.totalorder %s313_s16, 7 }
  0x2b   : > { %s553_s16 = smov (!%p138_p6, %s313_s16), 7 }
  0x2c   : > { %s320_s9 = sshll.u32 %s553_s16, 4 }
  0x2d   : > { %s142_s22 = scalar_lea.vmem %s544_s1, %s320_s9 }
  0x2f   : > { %158 = vrot.lane.b32.xlu1 %v147_v3, %s432_s19  ;;  %154 = vrot.lane.b32.xlu0 %v145_v4, %s432_s19 }
  0x31   : > { %182 = vrot.lane.b32.xlu2 %v173_v5, %s433_s20 }
  0x37   : > { %186 = vrot.lane.b32.xlu1 %v175_v6, %s433_s20  ;;  %184 = vrot.lane.b32.xlu0 %v174_v7, %s433_s20 }
  0x83   : > { %v181_v8 = vpop.permute.xlu2 %180 }
  0x8b   : > { %v183_v17 = vpop.permute.xlu2 %182 }
  0x99   : > { %v157_v9 = vpop.permute.xlu1 %156  ;;  %v153_v10 = vpop.permute.xlu0 %152 }
  0x9a   : > { %v164_v11 = vadd.f32 %v153_v10, %v144_v1  ;;  %v166_v18 = vadd.f32 %v157_v9, %v146_v0 }
  0x9c   : > { %v168_v12 = vmul.f32 0.27406862, %v164_v11  ;;  %v170_v22 = vmul.f32 0.27406862, %v166_v18 }
  0x9e   : > { %v192_v13 = vadd.f32 %v181_v8, %v168_v12 }
  0xa0   : > { %197 = vst.msk [vmem:[#allocation2] sm:$0xff] %vm196_vm0, %v192_v13 }
  0xa1   : > { %v159_v14 = vpop.permute.xlu1 %158  ;;  %v155_v15 = vpop.permute.xlu0 %154 }
  0xa2   : > { %v165_v16 = vadd.f32 %v155_v15, %v145_v4  ;;  %v167_v19 = vadd.f32 %v159_v14, %v147_v3 }
  0xa4   : > { %v169_v20 = vmul.f32 0.27406862, %v165_v16  ;;  %v171_v23 = vmul.f32 0.27406862, %v167_v19 }
  0xa6   : > { %v193_v21 = vadd.f32 %v183_v17, %v169_v20 }
  0xa7   : > { %v201_v28 = vld [vmem:[#allocation2] sm:$0xff] }
  0xa8   : > { %198 = vst.msk [vmem:[#allocation2 + $0x8] sm:$0xff] %vm196_vm0, %v193_v21 }
  0xa9   : > { %v187_v24 = vpop.permute.xlu1 %186  ;;  %v185_v25 = vpop.permute.xlu0 %184 }
  0xaa   : > { %v195_v26 = vadd.f32 %v187_v24, %v171_v23  ;;  %v194_v27 = vadd.f32 %v185_v25, %v170_v22 }
  0xac   : > { %200 = vst.msk [vmem:[#allocation2 + $0x18] sm:$0xff] %vm196_vm0, %v195_v26 }
  0xad   : > { %199 = vst.msk [vmem:[#allocation2 + $0x10] sm:$0xff] %vm196_vm0, %v194_v27 }
  0xaf   : > { %v202_v29 = vld [vmem:[#allocation2 + $0x8] sm:$0x3f] }
  0xb0   : > { %v205_v30 = vld [vmem:[#allocation2 + $0x2] sm:$0xff]  ;;  %v206_v31 = vld [vmem:[#allocation2 + $0xa] sm:$0x3f] }
  0xb1   : > { %v209_v32 = vadd.f32 %v205_v30, %v201_v28  ;;  %v210_v33 = vadd.f32 %v206_v31, %v202_v29  ;;  %v217_v34 = vld [vmem:[#allocation2 + $0x1] sm:$0xff]  ;;  %v218_v35 = vld [vmem:[#allocation2 + $0x9] sm:$0x3f] }
  0xb2   : > { %v221_v36 = vmul.f32 0.45186275, %v217_v34  ;;  %v222_v39 = vmul.f32 0.45186275, %v218_v35 }
  0xb3   : > { %v213_v37 = vmul.f32 0.27406862, %v209_v32  ;;  %v214_v38 = vmul.f32 0.27406862, %v210_v33  ;;  %v204_v40 = vld [vmem:[#allocation2 + $0x18] sm:$0x3f] }
  0xb4   : > { %v208_v41 = vld [vmem:[#allocation2 + $0x1a] sm:$0x3f]  ;;  %v203_v46 = vld [vmem:[#allocation2 + $0x10] sm:$0xff] }
  0xb5   : > { %v220_v42 = vld [vmem:[#allocation2 + $0x19] sm:$0x3f]  ;;  %v225_v43 = vadd.f32 %v221_v36, %v213_v37  ;;  %v226_v44 = vadd.f32 %v222_v39, %v214_v38  ;;  %v212_v45 = vadd.f32 %v208_v41, %v204_v40  ;;  %v219_v48 = vld [vmem:[#allocation2 + $0x11] sm:$0xff] }
  0xb6   : > { %v207_v47 = vld [vmem:[#allocation2 + $0x12] sm:$0xff]  ;;  %v224_v51 = vmul.f32 0.45186275, %v220_v42  ;;  %v223_v53 = vmul.f32 0.45186275, %v219_v48 }
  0xb7   : > { %v211_v49 = vadd.f32 %v207_v47, %v203_v46  ;;  %229 = vst.msk [vmem:[%s142_s22] sm:$0xff] %vm196_vm0, %v225_v43  ;;  %v216_v50 = vmul.f32 0.27406862, %v212_v45 }
  0xb8   : > { %231 = vst.msk [vmem:[%s142_s22 + $0x8] sm:$0x3f] %vm230_vm1, %v226_v44 }
  0xb9   : > { %v215_v52 = vmul.f32 0.27406862, %v211_v49  ;;  %v228_v54 = vadd.f32 %v224_v51, %v216_v50 }
  0xbb   : > { %v227_v55 = vadd.f32 %v223_v53, %v215_v52  ;;  %233 = vst.msk [vmem:[%s142_s22 + $0x18] sm:$0x3f] %vm230_vm1, %v228_v54 }
  0xbd   : > { %232 = vst.msk [vmem:[%s142_s22 + $0x10] sm:$0xff] %vm196_vm0, %v227_v55 }
  0xbe PF: > { %p11_p7 = scmp.ge.s32.totalorder %s464_s11, 6   ;;  %s548_s6 = smov %s420_s7 }
  0xbf   : > { %s549_s7 = smov %s424_s8  ;;  %s550_s8 = smov %s474_s14 }
  0xc0   : > { %s551_s9 = smov %s464_s11  ;;  %13 = sbr.rel (!%p11_p7) target bundleno = 3 (0x3), region = 64 }
  0xc5   :  { %258 = vsyncpa [#allocation4], 1 }
  0xc6   :  { %260 = vsyncpa [#allocation4 + $0x1], 1 }

</bundles_post_ra>
